<compile_context>
chip_gen: v7x
topology: tpu7x:2x2x1
jax: 0.10.0
libtpu: 0.0.40
codegen_flags: <defaults>
</compile_context>

<pallas_src>
import functools

import jax
import jax.numpy as jnp
from jax.experimental import pallas as pl
from jax.experimental.pallas import tpu as pltpu


def policy_net_kernel(x_ref, w1_ref, b1_ref, w2_ref, b2_ref, out_ref):
    # x block: [TILE_B, S]; weights pre-transposed to [in, out]; biases [1, out].
    x = x_ref[...]                                                        # [TB, S]
    # fc1 + ReLU
    h = jnp.dot(x, w1_ref[...], preferred_element_type=jnp.float32)      # [TB, H]
    h = jnp.maximum(h + b1_ref[...], 0.0)
    # fc2
    logits = jnp.dot(h, w2_ref[...], preferred_element_type=jnp.float32) # [TB, A]
    logits = logits + b2_ref[...]
    # numerically-stable softmax over the action dim (PyTorch dim=1)
    m = jnp.max(logits, axis=-1, keepdims=True)
    e = jnp.exp(logits - m)
    denom = jnp.sum(e, axis=-1, keepdims=True)
    out_ref[...] = (e * pl.reciprocal(denom, approx=False)).astype(out_ref.dtype)


def prepare_params(w1, b1, w2, b2):
    """One-time (init-time) repack of PyTorch nn.Linear params.

    w1: [hidden, state] -> [state, hidden]; w2: [action, hidden] -> [hidden, action];
    biases -> [1, out].  Call this ONCE; do not put it in the per-step hot path.
    """
    return (jnp.transpose(w1), b1.reshape(1, -1),
            jnp.transpose(w2), b2.reshape(1, -1))


@functools.partial(jax.jit, static_argnames=("tile_b",))
def policy_net_forward(x, w1_t, b1_r, w2_t, b2_r, *, tile_b=512):
    """x: [B, state_dim]; params already repacked by prepare_params()."""
    B, S = x.shape
    H = w1_t.shape[1]
    A = w2_t.shape[1]

    if B <= tile_b:
        # Single block covering the whole batch (full extent is always legal).
        tb, b_pad = B, B
        xp = x
    else:
        # Tiled batch: tile must be a sublane multiple of 8.
        assert tile_b % 8 == 0, "tile_b must be a multiple of 8"
        tb = tile_b
        b_pad = pl.cdiv(B, tb) * tb
        xp = jnp.pad(x, ((0, b_pad - B), (0, 0))) if b_pad != B else x

    grid = (b_pad // tb,)

    out = pl.pallas_call(
        policy_net_kernel,
        out_shape=jax.ShapeDtypeStruct((b_pad, A), jnp.float32),
        grid_spec=pltpu.PrefetchScalarGridSpec(
            num_scalar_prefetch=0,
            grid=grid,
            in_specs=[
                pl.BlockSpec((tb, S), lambda i: (i, 0)),   # x: streamed over B
                pl.BlockSpec((S, H), lambda i: (0, 0)),    # w1: resident
                pl.BlockSpec((1, H), lambda i: (0, 0)),    # b1: resident
                pl.BlockSpec((H, A), lambda i: (0, 0)),    # w2: resident
                pl.BlockSpec((1, A), lambda i: (0, 0)),    # b2: resident
            ],
            out_specs=pl.BlockSpec((tb, A), lambda i: (i, 0)),
        ),
        compiler_params=pltpu.CompilerParams(
            dimension_semantics=("parallel",)),            # shard batch across TCs (v7x)
    )(xp, w1_t, b1_r, w2_t, b2_r)

    return out[:B] if b_pad != B else out


def reference_forward(x, w1, b1, w2, b2):
    h = jnp.maximum(x @ w1.T + b1, 0.0)
    logits = h @ w2.T + b2
    return jax.nn.softmax(logits, axis=1)


if __name__ == "__main__":
    # Small shapes consistent with the module: state_dim=4, hidden_dim=32,
    # action_dim=2 (typical REINFORCE / CartPole config).
    state_dim, hidden_dim, action_dim = 4, 32, 2

    key = jax.random.PRNGKey(0)
    kx, k1, k2, k3, k4, kx2 = jax.random.split(key, 6)

    # Deterministic param init (uniform, scaled like PyTorch's 1/sqrt(fan_in)).
    w1 = jax.random.uniform(k1, (hidden_dim, state_dim), jnp.float32,
                            -1.0 / jnp.sqrt(state_dim), 1.0 / jnp.sqrt(state_dim))
    b1 = jax.random.uniform(k2, (hidden_dim,), jnp.float32,
                            -1.0 / jnp.sqrt(state_dim), 1.0 / jnp.sqrt(state_dim))
    w2 = jax.random.uniform(k3, (action_dim, hidden_dim), jnp.float32,
                            -1.0 / jnp.sqrt(hidden_dim), 1.0 / jnp.sqrt(hidden_dim))
    b2 = jax.random.uniform(k4, (action_dim,), jnp.float32,
                            -1.0 / jnp.sqrt(hidden_dim), 1.0 / jnp.sqrt(hidden_dim))

    # Hoisted out of the hot path: done once.
    params = prepare_params(w1, b1, w2, b2)

    # --- Case 1: tiny batch, single block (grid = 1) ---
    B = 8
    x = jax.random.normal(kx, (B, state_dim), dtype=jnp.float32)
    out = jax.block_until_ready(policy_net_forward(x, *params))
    ref = reference_forward(x, w1, b1, w2, b2)
    assert out.shape == (B, action_dim)
    assert jnp.allclose(out, ref, atol=1e-5, rtol=1e-5), "mismatch vs reference (B=8)"
    assert jnp.allclose(jnp.sum(out, axis=1), 1.0, atol=1e-5), "rows must sum to 1 (B=8)"

    # --- Case 2: exercise the batched grid path (grid > 1, padded tail) ---
    B2 = 20
    x2 = jax.random.normal(kx2, (B2, state_dim), dtype=jnp.float32)
    out2 = jax.block_until_ready(policy_net_forward(x2, *params, tile_b=8))
    ref2 = reference_forward(x2, w1, b1, w2, b2)
    assert out2.shape == (B2, action_dim)
    assert jnp.allclose(out2, ref2, atol=1e-5, rtol=1e-5), "mismatch vs reference (B=20)"
    assert jnp.allclose(jnp.sum(out2, axis=1), 1.0, atol=1e-5), "rows must sum to 1 (B=20)"

    print("KERNEL_OK")
</pallas_src>

<mosaic_0001>
module attributes {stable_mosaic.version = 11 : i64} {
  func.func @policy_net_kernel(%arg0: i32, %arg1: memref<8x4xf32, #tpu.memory_space<vmem>>, %arg2: memref<4x32xf32, #tpu.memory_space<vmem>>, %arg3: memref<1x32xf32, #tpu.memory_space<vmem>>, %arg4: memref<32x2xf32, #tpu.memory_space<vmem>>, %arg5: memref<1x2xf32, #tpu.memory_space<vmem>>, %arg6: memref<8x2xf32, #tpu.memory_space<vmem>>) attributes {dimension_semantics = [#tpu.dimension_semantics<parallel>], iteration_bounds = array<i64: 1>, scalar_prefetch = 0 : i64, scratch_operands = 0 : i64, tpu.core_type = #tpu.core_type<tc>, window_params = [{transform_indices = @transform_0, window_bounds = array<i64: 8, 4>}, {pipeline_mode = #tpu.pipeline_mode<synchronous>, transform_indices = @transform_1, window_bounds = array<i64: 4, 32>}, {pipeline_mode = #tpu.pipeline_mode<synchronous>, transform_indices = @transform_2, window_bounds = array<i64: 1, 32>}, {pipeline_mode = #tpu.pipeline_mode<synchronous>, transform_indices = @transform_3, window_bounds = array<i64: 32, 2>}, {pipeline_mode = #tpu.pipeline_mode<synchronous>, transform_indices = @transform_4, window_bounds = array<i64: 1, 2>}, {transform_indices = @transform_5, window_bounds = array<i64: 8, 2>}]} {
    %c0 = arith.constant 0 : index
    %c0_0 = arith.constant 0 : index
    %0 = vector.load %arg1[%c0, %c0_0] : memref<8x4xf32, #tpu.memory_space<vmem>>, vector<8x4xf32>
    %c0_1 = arith.constant 0 : index
    %c0_2 = arith.constant 0 : index
    %1 = vector.load %arg2[%c0_1, %c0_2] : memref<4x32xf32, #tpu.memory_space<vmem>>, vector<4x32xf32>
    %cst = arith.constant dense<0.000000e+00> : vector<8x32xf32>
    %2 = tpu.matmul %0, %1, %cst {dimension_numbers = #tpu.dot_dimension_numbers<[1], [0], [0], [1], [0, 0, 1, 1], [], []>} : vector<8x4xf32>, vector<4x32xf32>, vector<8x32xf32> -> vector<8x32xf32>
    %c0_3 = arith.constant 0 : index
    %c0_4 = arith.constant 0 : index
    %3 = vector.load %arg3[%c0_3, %c0_4] : memref<1x32xf32, #tpu.memory_space<vmem>>, vector<1x32xf32>
    %4 = vector.broadcast %3 : vector<1x32xf32> to vector<8x32xf32>
    %5 = arith.addf %2, %4 : vector<8x32xf32>
    %cst_5 = arith.constant 0.000000e+00 : f32
    %6 = vector.broadcast %cst_5 : f32 to vector<8x32xf32>
    %7 = arith.maximumf %5, %6 : vector<8x32xf32>
    %c0_6 = arith.constant 0 : index
    %c0_7 = arith.constant 0 : index
    %8 = vector.load %arg4[%c0_6, %c0_7] : memref<32x2xf32, #tpu.memory_space<vmem>>, vector<32x2xf32>
    %cst_8 = arith.constant dense<0.000000e+00> : vector<8x2xf32>
    %9 = tpu.matmul %7, %8, %cst_8 {dimension_numbers = #tpu.dot_dimension_numbers<[1], [0], [0], [1], [0, 0, 1, 1], [], []>} : vector<8x32xf32>, vector<32x2xf32>, vector<8x2xf32> -> vector<8x2xf32>
    %c0_9 = arith.constant 0 : index
    %c0_10 = arith.constant 0 : index
    %10 = vector.load %arg5[%c0_9, %c0_10] : memref<1x2xf32, #tpu.memory_space<vmem>>, vector<1x2xf32>
    %11 = vector.broadcast %10 : vector<1x2xf32> to vector<8x2xf32>
    %12 = arith.addf %9, %11 : vector<8x2xf32>
    %cst_11 = arith.constant dense<0xFF800000> : vector<8xf32>
    %13 = vector.multi_reduction <maximumf>, %12, %cst_11 [1] : vector<8x2xf32> to vector<8xf32>
    %14 = vector.shape_cast %13 : vector<8xf32> to vector<8x1xf32>
    %15 = vector.broadcast %14 : vector<8x1xf32> to vector<8x2xf32>
    %16 = arith.subf %12, %15 : vector<8x2xf32>
    %17 = math.exp %16 : vector<8x2xf32>
    %cst_12 = arith.constant dense<0.000000e+00> : vector<8xf32>
    %18 = vector.multi_reduction <add>, %17, %cst_12 [1] : vector<8x2xf32> to vector<8xf32>
    %19 = vector.shape_cast %18 : vector<8xf32> to vector<8x1xf32>
    %20 = tpu.reciprocal %19 : vector<8x1xf32> -> vector<8x1xf32>
    %21 = vector.broadcast %20 : vector<8x1xf32> to vector<8x2xf32>
    %22 = arith.mulf %17, %21 : vector<8x2xf32>
    %c0_13 = arith.constant 0 : index
    %c0_14 = arith.constant 0 : index
    %23 = vector.load %arg6[%c0_13, %c0_14] : memref<8x2xf32, #tpu.memory_space<vmem>>, vector<8x2xf32>
    tpu.vector_store %arg6[%c0_13, %c0_14], %22 {strides = array<i32>} : memref<8x2xf32, #tpu.memory_space<vmem>>, vector<8x2xf32>,
    return
  }
  func.func @transform_0(%arg0: i32) -> (i32, i32) {
    %c0_i32 = arith.constant 0 : i32
    %c0_i32_0 = arith.constant 0 : i32
    return %arg0, %c0_i32 : i32, i32
  }
  func.func @transform_1(%arg0: i32) -> (i32, i32) {
    %c0_i32 = arith.constant 0 : i32
    %c0_i32_0 = arith.constant 0 : i32
    %c0_i32_1 = arith.constant 0 : i32
    return %c0_i32, %c0_i32_0 : i32, i32
  }
  func.func @transform_2(%arg0: i32) -> (i32, i32) {
    %c0_i32 = arith.constant 0 : i32
    %c0_i32_0 = arith.constant 0 : i32
    %c0_i32_1 = arith.constant 0 : i32
    return %c0_i32, %c0_i32_0 : i32, i32
  }
  func.func @transform_3(%arg0: i32) -> (i32, i32) {
    %c0_i32 = arith.constant 0 : i32
    %c0_i32_0 = arith.constant 0 : i32
    %c0_i32_1 = arith.constant 0 : i32
    return %c0_i32, %c0_i32_0 : i32, i32
  }
  func.func @transform_4(%arg0: i32) -> (i32, i32) {
    %c0_i32 = arith.constant 0 : i32
    %c0_i32_0 = arith.constant 0 : i32
    %c0_i32_1 = arith.constant 0 : i32
    return %c0_i32, %c0_i32_0 : i32, i32
  }
  func.func @transform_5(%arg0: i32) -> (i32, i32) {
    %c0_i32 = arith.constant 0 : i32
    %c0_i32_0 = arith.constant 0 : i32
    return %arg0, %c0_i32 : i32, i32
  }
}

</mosaic_0001>

<bundles_post_ra>
// kernel: policy_net_forward.1
= control target key start
LH: loop header
LB: loop body
LE: loop exit
PB: predicated region body
PF: predicated region fallthrough
CT: control target
= control target key end

     0   :  { %vm33_vm0 = vcmask 1043456   ;;  %vm29_vm1 = vcmask 31744   ;;  %v251_v0 = vmov 0.0   ;;  %vm252_vm2 = vmmov 0   ;;  %s314_s1 = inlined_call_operand.vmem [shape: f32[4,32], index: 1, kind: input, shape index: {}]   ;;  %s315_s0 = inlined_call_operand.vmem [shape: f32[8,4], index: 0, kind: input, shape index: {}]   ;;  %s316_s3 = inlined_call_operand.vmem [shape: f32[32,2], index: 3, kind: input, shape index: {}]   ;;  %s317_s2 = inlined_call_operand.vmem [shape: f32[1,32], index: 2, kind: input, shape index: {}]   ;;  %s318_s4 = inlined_call_operand.vmem [shape: f32[1,2], index: 4, kind: input, shape index: {}]   ;;  %s319_s5 = inlined_call_operand.vmem [shape: f32[8,2], index: 5, kind: output, shape index: {}]  }
   0x1   :  { %222 = vmatprep.subr.mxu0 %v251_v0  ;;  %v21_v1 = vld [vmem:[%s314_s1] sm:$0xf]  ;;  %224 = vmatprep.mubr.msk.f32.mxu0 %vm252_vm2, %v251_v0  ;;  %v253_v4 = vmov 0.0|0.0   ;;  %v109_v5 = vld [vmem:[%s316_s3 + $0x8] sm:$0xff]  ;;  %v110_v7 = vld [vmem:[%s316_s3 + $0x10] sm:$0xff]  ;;  %vm119_vm3 = vcmask 261120  }
   0x2   :  { %v20_v2 = vld [vmem:[%s315_s0] sm:$0xff]  ;;  %223 = vmatpush3.msk.msra.mxu0 %vm33_vm0, %v21_v1  ;;  %238 = vmatprep.subr.bf16.mxu1 %v253_v4  ;;  %v111_v8 = vld [vmem:[%s316_s3 + $0x18] sm:$0xff]  ;;  %vm193_vm4 = vcmask 15360  }
   0x3   :  { %v108_v3 = vld [vmem:[%s316_s3] sm:$0xff]  ;;  %225 = vmatmul.mubr.msk.f32.vlgmr.msra.gmra.mrb[0].mxu0 %vm29_vm1, %v20_v2  ;;  %235 = vmatprep.mubr.msk.f32.mxu1 %vm252_vm2, %v251_v0  ;;  %v242_v9 = vpack.c.bf16 %v111_v8, %v110_v7 }
   0x4   :  { %v239_v6 = vpack.c.bf16 %v109_v5, %v108_v3  ;;  %v210_v10 = vld [vmem:[%s317_s2] ss:$0 sm:$0xff] }
   0x5   :  { %v213_v15 = vld [vmem:[%s318_s4] ss:$0 sm:$0xff] }
   0x6   :  { %240 = vmatpush3.bf16.msra.mxu1 %v239_v6 }
   0x7   :  { %241 = vmatprep.subr.bf16.mxu1 %v253_v4 }
   0xa   :  { %243 = vmatpush3.bf16.msra.mxu1 %v242_v9 }
  0xd6   :  { %v103_v11 = vpop.f32.mrb[0].mxu0 }
  0xd7   :  { %v104_v12 = vadd.f32 %v210_v10, %v103_v11  ;;  %v226_v13 = vpop.f32.mrb[1].mxu0 }
  0xd9   :  { %v107_v14 = vmax.f32 %v104_v12, 0.0 }
  0xdb   :  { %236 = vmatmul.mubr.msk.f32.vlgmr.msra.gmra.mrb[0].mxu1 %vm119_vm3, %v107_v14 }
 0x1ae   :  { %v189_v16 = vpop.f32.mrb[0].mxu1 }
 0x1af   :  { %v190_v17 = vadd.f32 %v213_v15, %v189_v16  ;;  %v237_v18 = vpop.f32.mrb[1].mxu1 }
 0x1b1   :  { %v194_v19 = vsel %vm193_vm4, %v190_v17, -inf }
 0x1b2   :  { %195 = vmax.xlane.f32.xlu0 %v194_v19 }
 0x23f   :  { %v196_v20 = vpop.xlane.xlu0 %195 }
 0x240   :  { %v197_v21 = vsub.f32 %v190_v17, %v196_v20 }
 0x242   :  { %v198_v22 = vmul.f32 1.442695, %v197_v21 }
 0x244   :  { %247 = vpow2.f32 %v198_v22 }
 0x24e   :  { %v248_v23 = vpop.eup %247 }
 0x24f   :  { %v200_v24 = vsel %vm193_vm4, %v248_v23, 0.0 }
 0x250   :  { %201 = vadd.xlane.f32.xlu0 %v200_v24 }
 0x2dd   :  { %v202_v25 = vpop.xlane.xlu0 %201 }
 0x2de   :  { %249 = vrcp.f32 %v202_v25 }
 0x2e8   :  { %v250_v26 = vpop.eup %249 }
 0x2e9   :  { %v204_v27 = vmul.f32 %v250_v26, %v248_v23 }
 0x2eb   :  { %205 = vst.msk [vmem:[%s319_s5] sm:$0xff] %vm193_vm4, %v204_v27 }

</bundles_post_ra>
